<compile_context>
chip_gen: v6e
topology: v6e:2x2x1
jax: 0.10.0
libtpu: 0.0.40
codegen_flags: <defaults>
</compile_context>

<pallas_src>
import functools

import jax
import jax.numpy as jnp
from jax import lax
from jax.experimental import pallas as pl
from jax.experimental.pallas import tpu as pltpu


def _round_up(x, m):
    return (x + m - 1) // m * m


def _partial_sums_kernel(pred_ref, tgt_ref,
                         inter_ref, sump_ref, sumt_ref, focal_ref, *,
                         num_classes, p_total, tile_p, focal_gamma):
    """One spatial tile: per-(class,batch) partial sums + focal partial sums.

    pred_ref : (C, N, tile_p) f32   logits (class on leading, cheap axis)
    tgt_ref  : (N, tile_p)    i32   labels
    inter_ref/sump_ref/sumt_ref : (1, C, N) f32  per-tile raw partial sums
    focal_ref: (1, 1, N) f32        per-tile per-batch sum of (1-pt)^g * ce
    """
    t = pl.program_id(0)
    tgt = tgt_ref[...]
    n, tp = tgt.shape

    # Mask lanes beyond the true spatial extent (last partial tile). Padded
    # logits are forced to 0 so every intermediate stays finite.
    lane = lax.broadcasted_iota(jnp.int32, (n, tp), 1)
    mask = (t * tile_p + lane) < p_total
    fmask = mask.astype(jnp.float32)

    preds = [jnp.where(mask, pred_ref[c], 0.0) for c in range(num_classes)]
    sels = [tgt == c for c in range(num_classes)]

    # log-sum-exp pieces: exp(pred_c - m) computed ONCE per class and reused.
    m = preds[0]
    for c in range(1, num_classes):
        m = jnp.maximum(m, preds[c])
    es = [jnp.exp(preds[c] - m) for c in range(num_classes)]
    s = es[0]
    for c in range(1, num_classes):
        s = s + es[c]
    inv_s = 1.0 / s            # exact reciprocal: keeps 1e-5 parity w/ reference
    lse = jnp.log(s) + m

    # Focal: ce = lse - logit[target]; pt = softmax prob of the target class
    # (reuses cached es -- no exp(-ce)).
    tgt_logit = jnp.zeros_like(m)
    e_tgt = jnp.zeros_like(m)
    for c in range(num_classes):
        tgt_logit = tgt_logit + jnp.where(sels[c], preds[c], 0.0)
        e_tgt = e_tgt + jnp.where(sels[c], es[c], 0.0)
    ce = lse - tgt_logit
    pt = e_tgt * inv_s
    om = 1.0 - pt
    if float(focal_gamma).is_integer():
        w = lax.integer_pow(om, int(focal_gamma))
    else:
        w = jnp.power(jnp.maximum(om, 0.0), focal_gamma)
    focal_ref[0, 0, :] = jnp.sum(w * ce * fmask, axis=1)

    # Dice / Tversky raw partial sums per (class, batch).
    inv_s_m = inv_s * fmask
    for c in range(num_classes):
        p_c = es[c] * inv_s_m                         # masked softmax prob
        t_c = jnp.where(sels[c], fmask, 0.0)          # masked one-hot
        inter_ref[0, c, :] = jnp.sum(p_c * t_c, axis=1)
        sump_ref[0, c, :] = jnp.sum(p_c, axis=1)
        sumt_ref[0, c, :] = jnp.sum(t_c, axis=1)


def focal_dice_tversky_loss(pred, target, *,
                            focal_alpha=1.0, focal_gamma=2.0,
                            tversky_alpha=0.5, tversky_beta=0.5,
                            focal_weight=0.33, dice_weight=0.33,
                            tversky_weight=0.34, tile_p=2048):
    """pred: (N, C, H, W) float logits (NCHW); target: (N, H, W) int labels."""
    N, C, H, W = pred.shape
    P = H * W

    # Layout plumbing: class axis leading, spatial on lanes.
    pred_cnp = jnp.transpose(pred, (1, 0, 2, 3)).reshape(C, N, P)
    pred_cnp = pred_cnp.astype(jnp.float32)
    tgt_np = target.reshape(N, P).astype(jnp.int32)

    if P <= tile_p:
        tile_p = P                        # full-extent block is always legal
    else:
        assert tile_p % 128 == 0, "tile_p must be lane (128) aligned"
    num_tiles = pl.cdiv(P, tile_p)

    # Explicit scoped-VMEM budget: double-buffered input tiles + headroom.
    n_pad = _round_up(max(N, 1), 8)
    lane_pad = _round_up(tile_p, 128)
    per_step = (C + 1) * n_pad * lane_pad * 4
    vmem_limit = int(min(max(2 * per_step + (4 << 20), 8 << 20), 64 << 20))

    kernel = functools.partial(
        _partial_sums_kernel,
        num_classes=C, p_total=P, tile_p=tile_p,
        focal_gamma=float(focal_gamma))

    inter_p, sump_p, sumt_p, focal_p = pl.pallas_call(
        kernel,
        out_shape=(
            jax.ShapeDtypeStruct((num_tiles, C, N), jnp.float32),
            jax.ShapeDtypeStruct((num_tiles, C, N), jnp.float32),
            jax.ShapeDtypeStruct((num_tiles, C, N), jnp.float32),
            jax.ShapeDtypeStruct((num_tiles, 1, N), jnp.float32),
        ),
        grid_spec=pltpu.PrefetchScalarGridSpec(
            num_scalar_prefetch=0,
            grid=(num_tiles,),
            in_specs=[
                pl.BlockSpec((C, N, tile_p), lambda t: (0, 0, t)),
                pl.BlockSpec((N, tile_p), lambda t: (0, t)),
            ],
            out_specs=[
                pl.BlockSpec((1, C, N), lambda t: (t, 0, 0)),
                pl.BlockSpec((1, C, N), lambda t: (t, 0, 0)),
                pl.BlockSpec((1, C, N), lambda t: (t, 0, 0)),
                pl.BlockSpec((1, 1, N), lambda t: (t, 0, 0)),
            ]),
        compiler_params=pltpu.CompilerParams(
            dimension_semantics=("parallel",),
            vmem_limit_bytes=vmem_limit),
    )(pred_cnp, tgt_np)

    # Tiny finalization in plain JAX (nonlinear ratios only after all tiles).
    inter = jnp.sum(inter_p, axis=0)          # (C, N)
    sum_p = jnp.sum(sump_p, axis=0)
    sum_t = jnp.sum(sumt_p, axis=0)

    focal_loss = focal_alpha * jnp.sum(focal_p) / (N * P)

    dice = (2.0 * inter + 1.0) / (sum_p + sum_t + 1.0)
    dice_loss = 1.0 - jnp.mean(dice)

    fp = sum_p - inter
    fn = sum_t - inter
    tv = (inter + 1.0) / (inter + tversky_alpha * fp + tversky_beta * fn + 1.0)
    tversky_loss = 1.0 - jnp.mean(tv)

    return (focal_weight * focal_loss + dice_weight * dice_loss
            + tversky_weight * tversky_loss)


def _reference(pred, target, *, focal_alpha=1.0, focal_gamma=2.0,
               tversky_alpha=0.5, tversky_beta=0.5,
               focal_weight=0.33, dice_weight=0.33, tversky_weight=0.34):
    # Pure-JAX mirror of the PyTorch module forward (verification only).
    C = pred.shape[1]
    logp = jax.nn.log_softmax(pred, axis=1)
    p = jnp.exp(logp)
    onehot = jax.nn.one_hot(target, C, axis=1, dtype=jnp.float32)  # (N,C,H,W)
    ce = -jnp.sum(onehot * logp, axis=1)                           # (N,H,W)
    pt = jnp.exp(-ce)
    focal = jnp.mean(focal_alpha * (1.0 - pt) ** focal_gamma * ce)
    inter = jnp.sum(p * onehot, axis=(2, 3))                       # (N,C)
    sum_p = jnp.sum(p, axis=(2, 3))
    sum_t = jnp.sum(onehot, axis=(2, 3))
    dice = (2.0 * inter + 1.0) / (sum_p + sum_t + 1.0)
    dice_loss = 1.0 - jnp.mean(dice)
    fp = sum_p - inter
    fn = sum_t - inter
    tv = (inter + 1.0) / (inter + tversky_alpha * fp + tversky_beta * fn + 1.0)
    tversky_loss = 1.0 - jnp.mean(tv)
    return (focal_weight * focal + dice_weight * dice_loss
            + tversky_weight * tversky_loss)


if __name__ == "__main__":
    key = jax.random.PRNGKey(0)
    k1, k2, k3, k4 = jax.random.split(key, 4)

    # Case 1: evenly divided spatial tiles (2 grid steps).
    N, C, H, W = 2, 3, 16, 16               # num_classes=3 per module default
    pred = jax.random.normal(k1, (N, C, H, W), dtype=jnp.float32)
    target = jax.random.randint(k2, (N, H, W), 0, C, dtype=jnp.int32)
    loss = jax.block_until_ready(focal_dice_tversky_loss(pred, target, tile_p=128))
    ref = _reference(pred, target)
    assert jnp.allclose(loss, ref, rtol=1e-5, atol=1e-5), (loss, ref)

    # Case 2: ragged spatial size -> partial last tile exercises the mask path.
    H2, W2 = 18, 14
    pred2 = jax.random.normal(k3, (N, C, H2, W2), dtype=jnp.float32)
    target2 = jax.random.randint(k4, (N, H2, W2), 0, C, dtype=jnp.int32)
    kwargs = dict(focal_alpha=0.25, focal_gamma=2.0,
                  tversky_alpha=0.3, tversky_beta=0.7)
    loss2 = jax.block_until_ready(
        focal_dice_tversky_loss(pred2, target2, tile_p=128, **kwargs))
    ref2 = _reference(pred2, target2, **kwargs)
    assert jnp.allclose(loss2, ref2, rtol=1e-5, atol=1e-5), (loss2, ref2)

    print("KERNEL_OK")
</pallas_src>

<mosaic_0001>
module attributes {stable_mosaic.version = 11 : i64} {
  func.func @_partial_sums_kernel(%arg0: i32, %arg1: memref<3x2x128xf32, #tpu.memory_space<vmem>>, %arg2: memref<2x128xi32, #tpu.memory_space<vmem>>, %arg3: memref<1x3x2xf32, #tpu.memory_space<vmem>>, %arg4: memref<1x3x2xf32, #tpu.memory_space<vmem>>, %arg5: memref<1x3x2xf32, #tpu.memory_space<vmem>>, %arg6: memref<1x1x2xf32, #tpu.memory_space<vmem>>) attributes {dimension_semantics = [#tpu.dimension_semantics<parallel>], iteration_bounds = array<i64: 2>, scalar_prefetch = 0 : i64, scratch_operands = 0 : i64, tpu.core_type = #tpu.core_type<tc>, window_params = [{transform_indices = @transform_0, window_bounds = array<i64: 3, 2, 128>}, {transform_indices = @transform_1, window_bounds = array<i64: 2, 128>}, {transform_indices = @transform_2, window_bounds = array<i64: 1, 3, 2>}, {transform_indices = @transform_3, window_bounds = array<i64: 1, 3, 2>}, {transform_indices = @transform_4, window_bounds = array<i64: 1, 3, 2>}, {transform_indices = @transform_5, window_bounds = array<i64: 1, 1, 2>}]} {
    %c0 = arith.constant 0 : index
    %c0_0 = arith.constant 0 : index
    %0 = vector.load %arg2[%c0, %c0_0] : memref<2x128xi32, #tpu.memory_space<vmem>>, vector<2x128xi32>
    %1 = tpu.iota {dimensions = array<i32: 1>} : vector<2x128xi32>
    %c128_i32 = arith.constant 128 : i32
    %2 = arith.muli %arg0, %c128_i32 : i32
    %3 = vector.broadcast %2 : i32 to vector<2x128xi32>
    %4 = arith.addi %3, %1 : vector<2x128xi32>
    %c256_i32 = arith.constant 256 : i32
    %5 = vector.broadcast %c256_i32 : i32 to vector<2x128xi32>
    %6 = arith.cmpi slt, %4, %5 : vector<2x128xi32>
    %7 = arith.extui %6 : vector<2x128xi1> to vector<2x128xi32>
    %8 = arith.sitofp %7 : vector<2x128xi32> to vector<2x128xf32>
    %c0_1 = arith.constant 0 : index
    %c0_2 = arith.constant 0 : index
    %c0_3 = arith.constant 0 : index
    %9 = vector.load %arg1[%c0_1, %c0_2, %c0_3] : memref<3x2x128xf32, #tpu.memory_space<vmem>>, vector<1x2x128xf32>
    %10 = vector.shape_cast %9 : vector<1x2x128xf32> to vector<2x128xf32>
    %cst = arith.constant 0.000000e+00 : f32
    %11 = vector.broadcast %cst : f32 to vector<2x128xf32>
    %12 = arith.select %6, %10, %11 : vector<2x128xi1>, vector<2x128xf32>
    %c1 = arith.constant 1 : index
    %c0_4 = arith.constant 0 : index
    %c0_5 = arith.constant 0 : index
    %13 = vector.load %arg1[%c1, %c0_4, %c0_5] : memref<3x2x128xf32, #tpu.memory_space<vmem>>, vector<1x2x128xf32>
    %14 = vector.shape_cast %13 : vector<1x2x128xf32> to vector<2x128xf32>
    %cst_6 = arith.constant 0.000000e+00 : f32
    %15 = vector.broadcast %cst_6 : f32 to vector<2x128xf32>
    %16 = arith.select %6, %14, %15 : vector<2x128xi1>, vector<2x128xf32>
    %c2 = arith.constant 2 : index
    %c0_7 = arith.constant 0 : index
    %c0_8 = arith.constant 0 : index
    %17 = vector.load %arg1[%c2, %c0_7, %c0_8] : memref<3x2x128xf32, #tpu.memory_space<vmem>>, vector<1x2x128xf32>
    %18 = vector.shape_cast %17 : vector<1x2x128xf32> to vector<2x128xf32>
    %cst_9 = arith.constant 0.000000e+00 : f32
    %19 = vector.broadcast %cst_9 : f32 to vector<2x128xf32>
    %20 = arith.select %6, %18, %19 : vector<2x128xi1>, vector<2x128xf32>
    %c0_i32 = arith.constant 0 : i32
    %21 = vector.broadcast %c0_i32 : i32 to vector<2x128xi32>
    %22 = arith.cmpi eq, %0, %21 : vector<2x128xi32>
    %c1_i32 = arith.constant 1 : i32
    %23 = vector.broadcast %c1_i32 : i32 to vector<2x128xi32>
    %24 = arith.cmpi eq, %0, %23 : vector<2x128xi32>
    %c2_i32 = arith.constant 2 : i32
    %25 = vector.broadcast %c2_i32 : i32 to vector<2x128xi32>
    %26 = arith.cmpi eq, %0, %25 : vector<2x128xi32>
    %27 = arith.maximumf %12, %16 : vector<2x128xf32>
    %28 = arith.maximumf %27, %20 : vector<2x128xf32>
    %29 = arith.subf %12, %28 : vector<2x128xf32>
    %30 = math.exp %29 : vector<2x128xf32>
    %31 = arith.subf %16, %28 : vector<2x128xf32>
    %32 = math.exp %31 : vector<2x128xf32>
    %33 = arith.subf %20, %28 : vector<2x128xf32>
    %34 = math.exp %33 : vector<2x128xf32>
    %35 = arith.addf %30, %32 : vector<2x128xf32>
    %36 = arith.addf %35, %34 : vector<2x128xf32>
    %cst_10 = arith.constant 1.000000e+00 : f32
    %37 = vector.broadcast %cst_10 : f32 to vector<2x128xf32>
    %38 = arith.divf %37, %36 : vector<2x128xf32>
    %39 = math.log %36 : vector<2x128xf32>
    %40 = arith.addf %39, %28 : vector<2x128xf32>
    %cst_11 = arith.constant 0.000000e+00 : f32
    %41 = vector.broadcast %cst_11 : f32 to vector<2x128xf32>
    %cst_12 = arith.constant 0.000000e+00 : f32
    %42 = vector.broadcast %cst_12 : f32 to vector<2x128xf32>
    %cst_13 = arith.constant 0.000000e+00 : f32
    %43 = vector.broadcast %cst_13 : f32 to vector<2x128xf32>
    %44 = arith.select %22, %12, %43 : vector<2x128xi1>, vector<2x128xf32>
    %45 = arith.addf %41, %44 : vector<2x128xf32>
    %cst_14 = arith.constant 0.000000e+00 : f32
    %46 = vector.broadcast %cst_14 : f32 to vector<2x128xf32>
    %47 = arith.select %22, %30, %46 : vector<2x128xi1>, vector<2x128xf32>
    %48 = arith.addf %42, %47 : vector<2x128xf32>
    %cst_15 = arith.constant 0.000000e+00 : f32
    %49 = vector.broadcast %cst_15 : f32 to vector<2x128xf32>
    %50 = arith.select %24, %16, %49 : vector<2x128xi1>, vector<2x128xf32>
    %51 = arith.addf %45, %50 : vector<2x128xf32>
    %cst_16 = arith.constant 0.000000e+00 : f32
    %52 = vector.broadcast %cst_16 : f32 to vector<2x128xf32>
    %53 = arith.select %24, %32, %52 : vector<2x128xi1>, vector<2x128xf32>
    %54 = arith.addf %48, %53 : vector<2x128xf32>
    %cst_17 = arith.constant 0.000000e+00 : f32
    %55 = vector.broadcast %cst_17 : f32 to vector<2x128xf32>
    %56 = arith.select %26, %20, %55 : vector<2x128xi1>, vector<2x128xf32>
    %57 = arith.addf %51, %56 : vector<2x128xf32>
    %cst_18 = arith.constant 0.000000e+00 : f32
    %58 = vector.broadcast %cst_18 : f32 to vector<2x128xf32>
    %59 = arith.select %26, %34, %58 : vector<2x128xi1>, vector<2x128xf32>
    %60 = arith.addf %54, %59 : vector<2x128xf32>
    %61 = arith.subf %40, %57 : vector<2x128xf32>
    %62 = arith.mulf %60, %38 : vector<2x128xf32>
    %cst_19 = arith.constant 1.000000e+00 : f32
    %63 = vector.broadcast %cst_19 : f32 to vector<2x128xf32>
    %64 = arith.subf %63, %62 : vector<2x128xf32>
    %65 = arith.mulf %64, %64 : vector<2x128xf32>
    %66 = arith.mulf %65, %61 : vector<2x128xf32>
    %67 = arith.mulf %66, %8 : vector<2x128xf32>
    %cst_20 = arith.constant dense<0.000000e+00> : vector<2xf32>
    %68 = vector.multi_reduction <add>, %67, %cst_20 [1] : vector<2x128xf32> to vector<2xf32>
    %c0_21 = arith.constant 0 : index
    %c0_22 = arith.constant 0 : index
    %c0_23 = arith.constant 0 : index
    %69 = vector.load %arg6[%c0_21, %c0_22, %c0_23] : memref<1x1x2xf32, #tpu.memory_space<vmem>>, vector<1x1x2xf32>
    %70 = vector.shape_cast %69 : vector<1x1x2xf32> to vector<2xf32>
    %71 = vector.shape_cast %68 : vector<2xf32> to vector<1x1x2xf32>
    tpu.vector_store %arg6[%c0_21, %c0_22, %c0_23], %71 {strides = array<i32>} : memref<1x1x2xf32, #tpu.memory_space<vmem>>, vector<1x1x2xf32>,
    %72 = arith.mulf %38, %8 : vector<2x128xf32>
    %73 = arith.mulf %30, %72 : vector<2x128xf32>
    %cst_24 = arith.constant 0.000000e+00 : f32
    %74 = vector.broadcast %cst_24 : f32 to vector<2x128xf32>
    %75 = arith.select %22, %8, %74 : vector<2x128xi1>, vector<2x128xf32>
    %76 = arith.mulf %73, %75 : vector<2x128xf32>
    %cst_25 = arith.constant dense<0.000000e+00> : vector<2xf32>
    %77 = vector.multi_reduction <add>, %76, %cst_25 [1] : vector<2x128xf32> to vector<2xf32>
    %c0_26 = arith.constant 0 : index
    %c0_27 = arith.constant 0 : index
    %c0_28 = arith.constant 0 : index
    %78 = vector.load %arg3[%c0_26, %c0_27, %c0_28] : memref<1x3x2xf32, #tpu.memory_space<vmem>>, vector<1x1x2xf32>
    %79 = vector.shape_cast %78 : vector<1x1x2xf32> to vector<2xf32>
    %80 = vector.shape_cast %77 : vector<2xf32> to vector<1x1x2xf32>
    tpu.vector_store %arg3[%c0_26, %c0_27, %c0_28], %80 {strides = array<i32>} : memref<1x3x2xf32, #tpu.memory_space<vmem>>, vector<1x1x2xf32>,
    %cst_29 = arith.constant dense<0.000000e+00> : vector<2xf32>
    %81 = vector.multi_reduction <add>, %73, %cst_29 [1] : vector<2x128xf32> to vector<2xf32>
    %c0_30 = arith.constant 0 : index
    %c0_31 = arith.constant 0 : index
    %c0_32 = arith.constant 0 : index
    %82 = vector.load %arg4[%c0_30, %c0_31, %c0_32] : memref<1x3x2xf32, #tpu.memory_space<vmem>>, vector<1x1x2xf32>
    %83 = vector.shape_cast %82 : vector<1x1x2xf32> to vector<2xf32>
    %84 = vector.shape_cast %81 : vector<2xf32> to vector<1x1x2xf32>
    tpu.vector_store %arg4[%c0_30, %c0_31, %c0_32], %84 {strides = array<i32>} : memref<1x3x2xf32, #tpu.memory_space<vmem>>, vector<1x1x2xf32>,
    %cst_33 = arith.constant dense<0.000000e+00> : vector<2xf32>
    %85 = vector.multi_reduction <add>, %75, %cst_33 [1] : vector<2x128xf32> to vector<2xf32>
    %c0_34 = arith.constant 0 : index
    %c0_35 = arith.constant 0 : index
    %c0_36 = arith.constant 0 : index
    %86 = vector.load %arg5[%c0_34, %c0_35, %c0_36] : memref<1x3x2xf32, #tpu.memory_space<vmem>>, vector<1x1x2xf32>
    %87 = vector.shape_cast %86 : vector<1x1x2xf32> to vector<2xf32>
    %88 = vector.shape_cast %85 : vector<2xf32> to vector<1x1x2xf32>
    tpu.vector_store %arg5[%c0_34, %c0_35, %c0_36], %88 {strides = array<i32>} : memref<1x3x2xf32, #tpu.memory_space<vmem>>, vector<1x1x2xf32>,
    %89 = arith.mulf %32, %72 : vector<2x128xf32>
    %cst_37 = arith.constant 0.000000e+00 : f32
    %90 = vector.broadcast %cst_37 : f32 to vector<2x128xf32>
    %91 = arith.select %24, %8, %90 : vector<2x128xi1>, vector<2x128xf32>
    %92 = arith.mulf %89, %91 : vector<2x128xf32>
    %cst_38 = arith.constant dense<0.000000e+00> : vector<2xf32>
    %93 = vector.multi_reduction <add>, %92, %cst_38 [1] : vector<2x128xf32> to vector<2xf32>
    %c0_39 = arith.constant 0 : index
    %c1_40 = arith.constant 1 : index
    %c0_41 = arith.constant 0 : index
    %94 = vector.load %arg3[%c0_39, %c1_40, %c0_41] : memref<1x3x2xf32, #tpu.memory_space<vmem>>, vector<1x1x2xf32>
    %95 = vector.shape_cast %94 : vector<1x1x2xf32> to vector<2xf32>
    %96 = vector.shape_cast %93 : vector<2xf32> to vector<1x1x2xf32>
    tpu.vector_store %arg3[%c0_39, %c1_40, %c0_41], %96 {strides = array<i32>} : memref<1x3x2xf32, #tpu.memory_space<vmem>>, vector<1x1x2xf32>,
    %cst_42 = arith.constant dense<0.000000e+00> : vector<2xf32>
    %97 = vector.multi_reduction <add>, %89, %cst_42 [1] : vector<2x128xf32> to vector<2xf32>
    %c0_43 = arith.constant 0 : index
    %c1_44 = arith.constant 1 : index
    %c0_45 = arith.constant 0 : index
    %98 = vector.load %arg4[%c0_43, %c1_44, %c0_45] : memref<1x3x2xf32, #tpu.memory_space<vmem>>, vector<1x1x2xf32>
    %99 = vector.shape_cast %98 : vector<1x1x2xf32> to vector<2xf32>
    %100 = vector.shape_cast %97 : vector<2xf32> to vector<1x1x2xf32>
    tpu.vector_store %arg4[%c0_43, %c1_44, %c0_45], %100 {strides = array<i32>} : memref<1x3x2xf32, #tpu.memory_space<vmem>>, vector<1x1x2xf32>,
    %cst_46 = arith.constant dense<0.000000e+00> : vector<2xf32>
    %101 = vector.multi_reduction <add>, %91, %cst_46 [1] : vector<2x128xf32> to vector<2xf32>
    %c0_47 = arith.constant 0 : index
    %c1_48 = arith.constant 1 : index
    %c0_49 = arith.constant 0 : index
    %102 = vector.load %arg5[%c0_47, %c1_48, %c0_49] : memref<1x3x2xf32, #tpu.memory_space<vmem>>, vector<1x1x2xf32>
    %103 = vector.shape_cast %102 : vector<1x1x2xf32> to vector<2xf32>
    %104 = vector.shape_cast %101 : vector<2xf32> to vector<1x1x2xf32>
    tpu.vector_store %arg5[%c0_47, %c1_48, %c0_49], %104 {strides = array<i32>} : memref<1x3x2xf32, #tpu.memory_space<vmem>>, vector<1x1x2xf32>,
    %105 = arith.mulf %34, %72 : vector<2x128xf32>
    %cst_50 = arith.constant 0.000000e+00 : f32
    %106 = vector.broadcast %cst_50 : f32 to vector<2x128xf32>
    %107 = arith.select %26, %8, %106 : vector<2x128xi1>, vector<2x128xf32>
    %108 = arith.mulf %105, %107 : vector<2x128xf32>
    %cst_51 = arith.constant dense<0.000000e+00> : vector<2xf32>
    %109 = vector.multi_reduction <add>, %108, %cst_51 [1] : vector<2x128xf32> to vector<2xf32>
    %c0_52 = arith.constant 0 : index
    %c2_53 = arith.constant 2 : index
    %c0_54 = arith.constant 0 : index
    %110 = vector.load %arg3[%c0_52, %c2_53, %c0_54] : memref<1x3x2xf32, #tpu.memory_space<vmem>>, vector<1x1x2xf32>
    %111 = vector.shape_cast %110 : vector<1x1x2xf32> to vector<2xf32>
    %112 = vector.shape_cast %109 : vector<2xf32> to vector<1x1x2xf32>
    tpu.vector_store %arg3[%c0_52, %c2_53, %c0_54], %112 {strides = array<i32>} : memref<1x3x2xf32, #tpu.memory_space<vmem>>, vector<1x1x2xf32>,
    %cst_55 = arith.constant dense<0.000000e+00> : vector<2xf32>
    %113 = vector.multi_reduction <add>, %105, %cst_55 [1] : vector<2x128xf32> to vector<2xf32>
    %c0_56 = arith.constant 0 : index
    %c2_57 = arith.constant 2 : index
    %c0_58 = arith.constant 0 : index
    %114 = vector.load %arg4[%c0_56, %c2_57, %c0_58] : memref<1x3x2xf32, #tpu.memory_space<vmem>>, vector<1x1x2xf32>
    %115 = vector.shape_cast %114 : vector<1x1x2xf32> to vector<2xf32>
    %116 = vector.shape_cast %113 : vector<2xf32> to vector<1x1x2xf32>
    tpu.vector_store %arg4[%c0_56, %c2_57, %c0_58], %116 {strides = array<i32>} : memref<1x3x2xf32, #tpu.memory_space<vmem>>, vector<1x1x2xf32>,
    %cst_59 = arith.constant dense<0.000000e+00> : vector<2xf32>
    %117 = vector.multi_reduction <add>, %107, %cst_59 [1] : vector<2x128xf32> to vector<2xf32>
    %c0_60 = arith.constant 0 : index
    %c2_61 = arith.constant 2 : index
    %c0_62 = arith.constant 0 : index
    %118 = vector.load %arg5[%c0_60, %c2_61, %c0_62] : memref<1x3x2xf32, #tpu.memory_space<vmem>>, vector<1x1x2xf32>
    %119 = vector.shape_cast %118 : vector<1x1x2xf32> to vector<2xf32>
    %120 = vector.shape_cast %117 : vector<2xf32> to vector<1x1x2xf32>
    tpu.vector_store %arg5[%c0_60, %c2_61, %c0_62], %120 {strides = array<i32>} : memref<1x3x2xf32, #tpu.memory_space<vmem>>, vector<1x1x2xf32>,
    return
  }
  func.func @transform_0(%arg0: i32) -> (i32, i32, i32) {
    %c0_i32 = arith.constant 0 : i32
    %c0_i32_0 = arith.constant 0 : i32
    %c0_i32_1 = arith.constant 0 : i32
    return %c0_i32, %c0_i32_0, %arg0 : i32, i32, i32
  }
  func.func @transform_1(%arg0: i32) -> (i32, i32) {
    %c0_i32 = arith.constant 0 : i32
    %c0_i32_0 = arith.constant 0 : i32
    return %c0_i32, %arg0 : i32, i32
  }
  func.func @transform_2(%arg0: i32) -> (i32, i32, i32) {
    %c0_i32 = arith.constant 0 : i32
    %c0_i32_0 = arith.constant 0 : i32
    %c0_i32_1 = arith.constant 0 : i32
    return %arg0, %c0_i32, %c0_i32_0 : i32, i32, i32
  }
  func.func @transform_3(%arg0: i32) -> (i32, i32, i32) {
    %c0_i32 = arith.constant 0 : i32
    %c0_i32_0 = arith.constant 0 : i32
    %c0_i32_1 = arith.constant 0 : i32
    return %arg0, %c0_i32, %c0_i32_0 : i32, i32, i32
  }
  func.func @transform_4(%arg0: i32) -> (i32, i32, i32) {
    %c0_i32 = arith.constant 0 : i32
    %c0_i32_0 = arith.constant 0 : i32
    %c0_i32_1 = arith.constant 0 : i32
    return %arg0, %c0_i32, %c0_i32_0 : i32, i32, i32
  }
  func.func @transform_5(%arg0: i32) -> (i32, i32, i32) {
    %c0_i32 = arith.constant 0 : i32
    %c0_i32_0 = arith.constant 0 : i32
    %c0_i32_1 = arith.constant 0 : i32
    return %arg0, %c0_i32, %c0_i32_0 : i32, i32, i32
  }
}

</mosaic_0001>

<bundles_post_ra>
// kernel: tpu_custom_call.1
= control target key start
LH: loop header
LB: loop body
LE: loop exit
PB: predicated region body
PF: predicated region fallthrough
CT: control target
= control target key end

     0   :  { %s1189_s0 = inlined_call_operand.hbm [shape: f32[3,2,256], index: 0, kind: input, shape index: {}]   ;;  %s1190_s1 = inlined_call_operand.hbm [shape: s32[2,256], index: 1, kind: input, shape index: {}]   ;;  %s1191_s2 = inlined_call_operand.vmem [shape: f32[2,3,2], index: 2, kind: output, shape index: {0}]   ;;  %s1192_s3 = inlined_call_operand.vmem [shape: f32[2,3,2], index: 3, kind: output, shape index: {1}]   ;;  %s1193_s4 = inlined_call_operand.vmem [shape: f32[2,3,2], index: 4, kind: output, shape index: {2}]   ;;  %s1194_s5 = inlined_call_operand.hbm [shape: f32[2,1,2], index: 5, kind: output, shape index: {3}]  }
   0x1   :  { %1197 = sst [smem:[#allocation11_spill]] %s1189_s0 }
   0x2   :  { %11 = vsyncpa [#allocation3], 0 }
   0x3   :  { %13 = vsyncpa [#allocation3 + $0x1], 0 }
   0x4   :  { %14 = vsyncpa [#allocation6], 0 }
   0x5   :  { %16 = vsyncpa [#allocation6 + $0x1], 0 }
   0x6   :  { %17 = vsyncpa [#allocation4], 0 }
   0x7   :  { %19 = vsyncpa [#allocation4 + $0x1], 0  ;;  %s920_s18 = smov 0   ;;  %s922_s19 = smov 0  }
   0x8   :  { %s924_s20 = smov 0   ;;  %s926_s21 = smov 0  }
   0x9 LB: > { %s941_s22 = sadd.s32 4294967295, %s881_s21   ;;  %s672_s23 = sadd.s32 4294967294, %s881_s21   ;;  %s881_s21 = sphi %s926_s21, %s1213_s21   ;;  %s877_s20 = sphi %s924_s20, %s1212_s20   ;;  %s873_s19 = sphi %s922_s19, %s1211_s19   ;;  %s869_s18 = sphi %s920_s18, %s1210_s18  }
   0xa   : > { %s945_s24 = sadd.s32 1, %s881_s21   ;;  %s32_s25 = sadd.s32 1, %s877_s20 }
   0xb   : > { %s29_s26 = ssub.s32 %s881_s21, %s945_s24  ;;  %p39_p0 = scmp.ne.s32.totalorder %s877_s20, %s873_s19 }
   0xc   : > { %p30_p1 = scmp.eq.s32.totalorder %s29_s26, 0  ;;  %p40_p2 = scmp.eq.s32.totalorder %s881_s21, 0 }
   0xd   : > { %p45_p3 = scmp.ne.s32.totalorder %s873_s19, %s869_s18  ;;  %p46_p4 = scmp.eq.s32.totalorder %s941_s22, 0 }
   0xe   : > { %s957_s27 = scalar_select %p30_p1, %s877_s20, %s32_s25  }
   0xf   : > { %p41_p5 = por %p40_p2, %p39_p0  ;;  %p959_p6 = por %p46_p4, %p45_p3 }
  0x10   : > { %p173_p7 = scmp.eq.s32.totalorder %s941_s22, 1  ;;  %p179_p8 = scmp.eq.s32.totalorder %s672_s23, 1 }
  0x11   : > { %s1198_s28 = scalar_select %p959_p6, 1, 0 }
  0x12   : > { %p709_p10 = scmp.lt.s32.totalorder %s881_s21, 2  ;;  %p966_p11 = por %p173_p7, %p39_p0 }
  0x13   : > { %p970_p12 = por %p179_p8, %p45_p3  ;;  %s975_s6 = sand.u32 1, %s877_s20  }
  0x14   : > { %s1199_s29 = scalar_select %p966_p11, 1, 0 }
  0x15   : > { %s1200_s30 = scalar_select %p970_p12, 1, 0 }
  0x16   : > { %s675_s7 = sshll.u32 %s881_s21, 5  ;;  %s690_s8 = smul.u32 6, %s975_s6 }
  0x17   : > { %s1201_s0 = sld [smem:[#allocation11_spill]]  ;;  %p986_p13 = pnand %p709_p10, %p41_p5 }
  0x18   : > { %s203_s13 = scalar_lea.vmem [#allocation2], %s690_s8  ;;  %s200_s15 = scalar_lea.sflag [#allocation3], %s975_s6 }
  0x19   : > { %s209_s14 = sshll.u32 %s203_s13, 4  ;;  %p759_p2 = pneg %p986_p13  ;;  %s990_s14 = int_to_ptr.vmem [resolvable:$true] %s209_s14 }
  0x1d   : > { %s984_s11 = scalar_lea.hbm %s1201_s0, %s675_s7  ;;  %s762_s25 = scalar_lea.hbm %s1201_s0, 192 }
  0x1e   : > { %s757_s16 = scalar_lea.hbm %s984_s11, 96  ;;  %p763_p5 = scmp.lt.s32.totalorder %s984_s11, %s1201_s0 }
  0x1f   : > { %p758_p1 = scmp.ne.s32.totalorder %s984_s11, %s757_s16  ;;  %p764_p7 = scmp.lt.s32.totalorder %s762_s25, %s757_s16 }
  0x21   : > { %p760_p3 = pnand %p759_p2, %p758_p1  ;;  %p765_p8 = por %p764_p7, %p763_p5 }
  0x23   : > { %p761_p4 = pneg %p760_p3 }
  0x25   : > { %p766_p10 = pnand %p765_p8, %p761_p4 }
  0x27   : > { %769 = shalt.err (!%p766_p10)
}
  0x28   : > { %s770_s8 = scalar_lea.vmem %s990_s14, 96  ;;  %s883_s10 = smov [#allocation2]  }
  0x29   : > { %p771_p9 = scmp.ne.s32.totalorder %s990_s14, %s770_s8  ;;  %s775_s13 = sshll.u32 %s883_s10, 4  ;;  %s776_s13 = int_to_ptr.vmem [resolvable:$false] %s775_s13 }
  0x2a   : > { %s777_s17 = scalar_lea.vmem %s776_s13, 192  ;;  %p778_p0 = scmp.lt.s32.totalorder %s990_s14, %s776_s13 }
  0x2b   : > { %p773_p1 = pnand %p771_p9, %p759_p2  ;;  %p779_p12 = scmp.lt.s32.totalorder %s777_s17, %s770_s8 }
  0x2d   : > { %p774_p3 = pneg %p773_p1  ;;  %p780_p11 = por %p779_p12, %p778_p0 }
  0x2f   : > { %p781_p5 = pnand %p780_p11, %p774_p3 }
  0x31   : > { %784 = shalt.err (!%p781_p5)
}
  0x32   : > { %s884_s16 = smov 64   ;;  %s885_s23 = smov 32  }
  0x33   : > { %s886_s25 = smov 2   ;;  %p235_p9 = scmp.lt.s32.totalorder %s881_s21, 3 }
  0x34   : > { %701 = dma.hbm_to_vmem [thread:$0]  (!%p986_p13), %s984_s11, 96, %s990_s14, %s200_s15, %s884_s16, %s885_s23, %s886_s25  }
  0x35   : > { %s676_s26 = sshll.u32 %s975_s6, 1  ;;  %s1027_s10 = scalar_lea.hbm %s1190_s1, %s675_s7 }
  0x36   : > { %p1203_p11 = scmp.ge.s32.totalorder %s881_s21, 1  ;;  %s223_s17 = scalar_lea.vmem [#allocation5], %s676_s26 }
  0x37   : > { %s230_s0 = sshll.u32 %s223_s17, 4  ;;  %s220_s11 = scalar_lea.sflag [#allocation6], %s975_s6  ;;  %s231_s0 = int_to_ptr.vmem [resolvable:$true] %s230_s0 }
  0x38   : > { %p1031_p12 = pnand %p1203_p11, %p235_p9  ;;  %s785_s14 = scalar_lea.hbm %s1027_s10, 32 }
  0x39   : > { %p786_p0 = scmp.ne.s32.totalorder %s1027_s10, %s785_s14  ;;  %s790_s16 = scalar_lea.hbm %s1190_s1, 64 }
  0x3a   : > { %s1204_s13 = scalar_select %p1031_p12, 1, 0 }
  0x3b   : > { %p788_p4 = pnand %p786_p0, %p759_p2  ;;  %p791_p8 = scmp.lt.s32.totalorder %s1027_s10, %s1190_s1 }
  0x3c   : > { %p792_p10 = scmp.lt.s32.totalorder %s790_s16, %s785_s14 }
  0x3d   : > { %p789_p7 = pneg %p788_p4 }
  0x3e   : > { %p793_p1 = por %p792_p10, %p791_p8 }
  0x40   : > { %p794_p3 = pnand %p793_p1, %p789_p7 }
  0x42   : > { %797 = shalt.err (!%p794_p3)
}
  0x43   : > { %s798_s26 = scalar_lea.vmem %s231_s0, 32  ;;  %s887_s6 = smov [#allocation5]  }
  0x44   : > { %p799_p5 = scmp.ne.s32.totalorder %s231_s0, %s798_s26  ;;  %s803_s9 = sshll.u32 %s887_s6, 4  ;;  %s804_s9 = int_to_ptr.vmem [resolvable:$false] %s803_s9 }
  0x45   : > { %s805_s8 = scalar_lea.vmem %s804_s9, 64  ;;  %p806_p0 = scmp.lt.s32.totalorder %s231_s0, %s804_s9 }
  0x46   : > { %p801_p9 = pnand %p799_p5, %p759_p2  ;;  %p807_p4 = scmp.lt.s32.totalorder %s805_s8, %s798_s26 }
  0x48   : > { %p802_p11 = pneg %p801_p9  ;;  %p808_p6 = por %p807_p4, %p806_p0 }
  0x4a   : > { %p809_p12 = pnand %p808_p6, %p802_p11 }
  0x4c   : > { %812 = shalt.err (!%p809_p12)
}
  0x4d   : > { %704 = dma.hbm_to_vmem [thread:$0]  (!%p986_p13), %s1027_s10, 32, %s231_s0, %s220_s11  }
  0x4e   : > { %p1205_p7 = scmp.ne.s32.totalorder %s1204_s13, 0 }
  0x4f   : > { %s1057_s17 = sand.u32 (!%p1205_p7), 1, %s873_s19   ;;  %p1206_p2 = scmp.ne.s32.totalorder (!%p1205_p7), %s1198_s28, 0 }
  0x50   : > { %239 = sbr.rel (%p1205_p7) target bundleno = 309 (0x135), region = 28  ;;  %s242_s7 = scalar_lea.sflag (!%p1205_p7), [#allocation3], %s1057_s17 }
  0x51   : > { %s691_s14 = smul.u32 (!%p1205_p7), 6, %s1057_s17 }
  0x53   : > { %s245_s15 = scalar_lea.vmem (!%p1205_p7), [#allocation2], %s691_s14 }
  0x55   : > { %856 = dma.done.wait (%p1206_p2), %s242_s7, 96  }
  0x56   : > { %858 = vsyncadd (%p1206_p2), %s242_s7, 4294967200  ;;  %s679_s0 = sshll.u32 %s1057_s17, 1  ;;  %s251_s12 = scalar_lea.sflag [#allocation6], %s1057_s17 }
  0x57   : > { %s254_s10 = scalar_lea.vmem [#allocation5], %s679_s0 }
  0x58   : > { %860 = dma.done.wait (%p1206_p2), %s251_s12, 32  }
  0x59   : > { %862 = vsyncadd (%p1206_p2), %s251_s12, 4294967264  ;;  %v310_v0 = vlaneseq  ;;  %s683_s13 = sshll.u32 %s941_s22, 7  ;;  %v309_v6 = vld [vmem:[%s254_s10] sm:$0x3]  ;;  %v888_v7 = vmov 0.0   ;;  %vm365_vm1 = vcmask 1041408  }
  0x5a   : > { %v313_v1 = vstv %s683_s13  ;;  %v318_v9 = vld [vmem:[%s245_s15] sm:$0x3]  ;;  %v685_v11 = vld [vmem:[%s245_s15 + $0x2] sm:$0x3]  ;;  %v686_v12 = vld [vmem:[%s245_s15 + $0x4] sm:$0x3] }
  0x5b   : > { %v311_v2 = vand.u32 127, %v310_v0  ;;  %v371_v3 = vshrl.u32 %v310_v0, 7  ;;  %vm327_vm2 = vcmp.eq.s32.totalorder %v309_v6, 1  ;;  %vm326_vm3 = vcmp.eq.s32.totalorder %v309_v6, 0  ;;  %p297_p6 = scmp.lt.s32.totalorder %s941_s22, 1  ;;  %s687_s15 = sshll.u32 %s941_s22, 4 }
  0x5c   : > { %vm328_vm4 = vcmp.eq.s32.totalorder %v309_v6, 2  ;;  %vm375_vm5 = vcmask 8192   ;;  %s296_s0 = scalar_lea.vmem [#allocation7], %s1057_s17  ;;  %p1207_p12 = scmp.ne.s32.totalorder %s1199_s29, 0 }
  0x5d   : > { %v314_v4 = vadd.s32 %v313_v1, %v311_v2  ;;  %v1072_v5 = vsub.s32 %v311_v2, %v371_v3  ;;  %s298_s28 = scalar_select %p297_p6, %s941_s22, 1 }
  0x5e   : > { %s511_s12 = sshll.u32 %s296_s0, 4  ;;  %s490_s22 = scalar_lea.sflag [#allocation4], %s1057_s17  ;;  %s1141_s12 = int_to_ptr.vmem [resolvable:$true] %s511_s12 }
  0x5f   : > { %vm315_vm0 = vcmp.lt.s32.totalorder %v314_v4, 256  ;;  %s680_s11 = sshll.u32 %s298_s28, 2  ;;  %s1139_s28 = scalar_lea.hbm %s1194_s5, %s687_s15 }
  0x60   : > { %v1074_v8 = vsel %vm315_vm0, 1.0, %v888_v7  ;;  %v319_v10 = vsel %vm315_vm0, %v318_v9, 0.0  ;;  %v322_v13 = vsel %vm315_vm0, %v685_v11, 0.0  ;;  %v325_v14 = vsel %vm315_vm0, %v686_v12, 0.0  ;;  %s1105_s25 = scalar_lea.vmem %s1193_s4, %s680_s11  ;;  %s1116_s9 = scalar_lea.vmem %s1192_s3, %s680_s11 }
  0x61   : > { %v412_v15 = vsel %vm327_vm2, %v1074_v8, 0.0  ;;  %v329_v16 = vmax.f32 %v319_v10, %v322_v13  ;;  %v379_v18 = vsel %vm326_vm3, %v1074_v8, 0.0  ;;  %v351_v36 = vsel %vm327_vm2, %v322_v13, 0.0  ;;  %s300_s7 = scalar_lea.vmem %s1191_s2, %s680_s11  ;;  %s813_s11 = scalar_lea.vmem %s1141_s12, 16 }
  0x62   : > { %v434_v17 = vsel %vm365_vm1, %v412_v15, 0.0  ;;  %v401_v19 = vsel %vm365_vm1, %v379_v18, 0.0  ;;  %v347_v37 = vsel %vm326_vm3, %v319_v10, 0.0  ;;  %v355_v40 = vsel %vm328_vm4, %v325_v14, 0.0  ;;  %p814_p13 = scmp.ne.s32.totalorder %s1141_s12, %s813_s11  ;;  %s889_s16 = smov [#allocation7]  }
  0x63   : > { %435 = vadd.xlane.f32.xlu0 %v434_v17  ;;  %v330_v20 = vmax.f32 %v329_v16, %v325_v14  ;;  %402 = vadd.xlane.f32.xlu1 %v401_v19  ;;  %v352_v39 = vadd.f32 %v351_v36, %v347_v37  ;;  %v445_v51 = vsel %vm328_vm4, %v1074_v8, 0.0  ;;  %s817_s23 = sshll.u32 %s889_s16, 4  ;;  %s818_s23 = int_to_ptr.vmem [resolvable:$false] %s817_s23 }
  0x64   : > { %v467_v2 = vsel %vm365_vm1, %v445_v51, 0.0  ;;  %p815_p8 = pnand %p814_p13, %p1207_p12  ;;  %s819_s26 = scalar_lea.vmem %s818_s23, 32 }
  0x65   : > { %v331_v21 = vsub.f32 %v319_v10, %v330_v20  ;;  %v334_v22 = vsub.f32 %v322_v13, %v330_v20  ;;  %v337_v23 = vsub.f32 %v325_v14, %v330_v20  ;;  %v356_v46 = vadd.f32 %v355_v40, %v352_v39  ;;  %p820_p1 = scmp.lt.s32.totalorder %s1141_s12, %s818_s23  ;;  %p821_p3 = scmp.lt.s32.totalorder %s819_s26, %s813_s11 }
  0x66   : > { %p816_p10 = pneg %p815_p8 }
  0x67   : > { %v332_v24 = vmul.f32 1.442695, %v331_v21  ;;  %v335_v25 = vmul.f32 1.442695, %v334_v22  ;;  %v338_v26 = vmul.f32 1.442695, %v337_v23  ;;  %p822_p5 = por %p821_p3, %p820_p1 }
  0x69   : > { %747 = vpow2.f32 %v332_v24  ;;  %p823_p9 = pnand %p822_p5, %p816_p10 }
  0x6a   : > { %749 = vpow2.f32 %v335_v25 }
  0x6b   : > { %751 = vpow2.f32 %v338_v26 }
  0x76   : > { %v748_v27 = vpop.eup %747 }
  0x77   : > { %v750_v28 = vpop.eup %749  ;;  %v349_v33 = vsel %vm326_vm3, %v748_v27, 0.0 }
  0x78   : > { %v752_v29 = vpop.eup %751  ;;  %v340_v30 = vadd.f32 %v750_v28, %v748_v27  ;;  %v353_v32 = vsel %vm327_vm2, %v750_v28, 0.0 }
  0x79   : > { %v354_v34 = vadd.f32 %v353_v32, %v349_v33  ;;  %v357_v35 = vsel %vm328_vm4, %v752_v29, 0.0 }
  0x7a   : > { %v341_v31 = vadd.f32 %v752_v29, %v340_v30 }
  0x7b   : > { %v358_v38 = vadd.f32 %v357_v35, %v354_v34 }
  0x7c   : > { %753 = vrcp.f32 %v341_v31 }
  0x7d   : > { %755 = vlog2.f32 %v341_v31 }
  0x89   : > { %v754_v41 = vpop.eup %753 }
  0x8a   : > { %v756_v42 = vpop.eup %755  ;;  %v377_v43 = vmul.f32 %v754_v41, %v1074_v8  ;;  %v360_v44 = vmul.f32 %v754_v41, %v358_v38 }
  0x8b   : > { %v345_v45 = vmul.f32 0.6931472, %v756_v42 }
  0x8c   : > { %v411_v47 = vmul.f32 %v750_v28, %v377_v43  ;;  %v378_v48 = vmul.f32 %v748_v27, %v377_v43  ;;  %v444_v49 = vmul.f32 %v752_v29, %v377_v43  ;;  %v361_v50 = vsub.f32 1.0, %v360_v44 }
  0x8d   : > { %v346_v52 = vadd.f32 %v345_v45, %v330_v20 }
  0x8e   : > { %v413_v53 = vmul.f32 %v412_v15, %v411_v47  ;;  %v380_v54 = vmul.f32 %v379_v18, %v378_v48  ;;  %v391_v55 = vsel %vm365_vm1, %v378_v48, 0.0  ;;  %v362_v57 = vmul.f32 %v361_v50, %v361_v50 }
  0x8f   : > { %392 = vadd.xlane.f32.xlu1 %v391_v55  ;;  %v359_v56 = vsub.f32 %v346_v52, %v356_v46  ;;  %v424_v59 = vsel %vm365_vm1, %v411_v47, 0.0  ;;  %v446_v60 = vmul.f32 %v445_v51, %v444_v49  ;;  %v457_v3 = vsel %vm365_vm1, %v444_v49, 0.0 }
  0x90   : > { %v381_v58 = vsel %vm365_vm1, %v380_v54, 0.0  ;;  %v414_v62 = vsel %vm365_vm1, %v413_v53, 0.0 }
  0x91   : > { %382 = vadd.xlane.f32.xlu0 %v381_v58  ;;  %v363_v61 = vmul.f32 %v362_v57, %v359_v56  ;;  %v447_v0 = vsel %vm365_vm1, %v446_v60, 0.0 }
  0x93   : > { %425 = vadd.xlane.f32.xlu1 %v424_v59  ;;  %v364_v63 = vmul.f32 %v1074_v8, %v363_v61 }
  0x95   : > { %415 = vadd.xlane.f32.xlu0 %v414_v62  ;;  %v366_v1 = vsel %vm365_vm1, %v364_v63, 0.0 }
  0x97   : > { %448 = vadd.xlane.f32.xlu1 %v447_v0 }
  0x99   : > { %367 = vadd.xlane.f32.xlu0 %v366_v1 }
  0x9b   : > { %468 = vadd.xlane.f32.xlu1 %v467_v2 }
  0x9d   : > { %458 = vadd.xlane.f32.xlu0 %v457_v3 }
  0xec   : > { %v436_v4 = vpop.xlane.xlu0 %435  ;;  %v403_v7 = vpop.xlane.xlu1 %402 }
  0xed   : > { %v441_v6 = vrot.slane %v436_v4, %v1072_v5  ;;  %v408_v8 = vrot.slane %v403_v7, %v1072_v5 }
  0xef   : > { %443 = vst.msk [vmem:[%s1105_s25 + $0x1] sm:$0x1] %vm375_vm5, %v441_v6  ;;  %410 = vst.msk [vmem:[%s1105_s25] sm:$0x1] %vm375_vm5, %v408_v8 }
 0x118   : > { %v393_v9 = vpop.xlane.xlu1 %392 }
 0x119   : > { %v398_v10 = vrot.slane %v393_v9, %v1072_v5 }
 0x11a   : > { %v383_v11 = vpop.xlane.xlu0 %382 }
 0x11b   : > { %400 = vst.msk [vmem:[%s1116_s9] sm:$0x1] %vm375_vm5, %v398_v10  ;;  %v388_v12 = vrot.slane %v383_v11, %v1072_v5 }
 0x11c   : > { %v426_v13 = vpop.xlane.xlu1 %425 }
 0x11d   : > { %390 = vst.msk [vmem:[%s300_s7] sm:$0x1] %vm375_vm5, %v388_v12  ;;  %v431_v14 = vrot.slane %v426_v13, %v1072_v5 }
 0x11e   : > { %v416_v15 = vpop.xlane.xlu0 %415 }
 0x11f   : > { %433 = vst.msk [vmem:[%s1116_s9 + $0x1] sm:$0x1] %vm375_vm5, %v431_v14  ;;  %v421_v16 = vrot.slane %v416_v15, %v1072_v5 }
 0x120   : > { %v449_v17 = vpop.xlane.xlu1 %448 }
 0x121   : > { %423 = vst.msk [vmem:[%s300_s7 + $0x1] sm:$0x1] %vm375_vm5, %v421_v16  ;;  %v454_v18 = vrot.slane %v449_v17, %v1072_v5 }
 0x122   : > { %v368_v19 = vpop.xlane.xlu0 %367 }
 0x123   : > { %456 = vst.msk [vmem:[%s300_s7 + $0x2] sm:$0x1] %vm375_vm5, %v454_v18  ;;  %v373_v20 = vrot.slane %v368_v19, %v1072_v5 }
 0x124   : > { %v469_v21 = vpop.xlane.xlu1 %468 }
 0x125   : > { %v474_v22 = vrot.slane %v469_v21, %v1072_v5  ;;  %376 = vst.msk [vmem:[%s296_s0] sm:$0x1] %vm375_vm5, %v373_v20 }
 0x126   : > { %v459_v23 = vpop.xlane.xlu0 %458 }
 0x127   : > { %826 = shalt.err (!%p823_p9)
}
 0x128   : > { %s827_s6 = scalar_lea.hbm %s1139_s28, 16  ;;  %s831_s14 = scalar_lea.hbm %s1194_s5, 32 }
 0x129   : > { %p828_p11 = scmp.ne.s32.totalorder %s1139_s28, %s827_s6  ;;  %p832_p7 = scmp.lt.s32.totalorder %s1139_s28, %s1194_s5 }
 0x12a   : > { %p833_p2 = scmp.lt.s32.totalorder %s831_s14, %s827_s6 }
 0x12b   : > { %p829_p0 = pnand %p828_p11, %p1207_p12 }
 0x12c   : > { %p834_p6 = por %p833_p2, %p832_p7 }
 0x12d   : > { %p830_p4 = pneg %p829_p0 }
 0x12f   : > { %p835_p13 = pnand %p834_p6, %p830_p4 }
 0x131   : > { %838 = shalt.err (!%p835_p13)
}
 0x132   : > { %696 = dma.vmem_to_hbm [thread:$0]  (%p1207_p12), %s1141_s12, 16, %s1139_s28, %s490_s22   ;;  %476 = vst.msk [vmem:[%s1105_s25 + $0x2] sm:$0x1] %vm375_vm5, %v474_v22  ;;  %v464_v24 = vrot.slane %v459_v23, %v1072_v5 }
 0x134   : > { %466 = vst.msk [vmem:[%s1116_s9 + $0x2] sm:$0x1] %vm375_vm5, %v464_v24 }
 0x135 PF: > { %s544_s0 = sand.u32 1, %s869_s18   ;;  %p1208_p8 = scmp.ne.s32.totalorder %s1200_s30, 0 }
 0x136   : > { %p1209_p10 = scmp.ge.s32.totalorder %s881_s21, 2  ;;  %s545_s29 = scalar_lea.sflag [#allocation4], %s544_s0 }
 0x138   : > { %p706_p1 = pnand %p1209_p10, %p1208_p8 }
 0x13a   : > { %p707_p3 = pneg %p706_p1 }
 0x13c   : > { %864 = dma.done.wait (%p707_p3), %s545_s29, 16  }
 0x13d   : > { %866 = vsyncadd (%p707_p3), %s545_s29, 4294967280  ;;  %p22_p12 = scmp.ge.s32.totalorder %s945_s24, 4   ;;  %s1210_s18 = smov %s873_s19 }
 0x13e   : > { %s1211_s19 = smov %s877_s20  ;;  %s1212_s20 = smov %s957_s27 }
 0x13f   : > { %s1213_s21 = smov %s945_s24  ;;  %24 = sbr.rel (!%p22_p12) target bundleno = 9 (0x9), region = 124 }
 0x144   :  { %549 = vsyncpa [#allocation3], 1 }
 0x145   :  { %551 = vsyncpa [#allocation3 + $0x1], 1 }
 0x146   :  { %552 = vsyncpa [#allocation6], 1 }
 0x147   :  { %554 = vsyncpa [#allocation6 + $0x1], 1 }
 0x148   :  { %555 = vsyncpa [#allocation4], 1 }
 0x149   :  { %557 = vsyncpa [#allocation4 + $0x1], 1 }

</bundles_post_ra>
